<compile_context>
chip_gen: v7x
topology: tpu7x:2x2x1
jax: 0.10.0
libtpu: 0.0.40
codegen_flags: <defaults>
</compile_context>

<pallas_src>
import functools

import jax
import jax.numpy as jnp
from jax.experimental import pallas as pl
from jax.experimental.pallas import tpu as pltpu


def _laplacian_kernel(x_ref, o_ref, *, neg_inv_a):
    # Compute in f32 (robust for bf16/fp16 inputs), cast on store.
    x = x_ref[...].astype(jnp.float32)
    o_ref[...] = jnp.exp(jnp.abs(x) * neg_inv_a).astype(o_ref.dtype)


_TARGET_BLOCK_BYTES = 2 << 20  # ~2 MiB per block (byte-based, dtype-agnostic)
_LANE = 128


def laplacian(x, a=1.0):
    """Elementwise exp(-|x| / a), matching torch.exp(-torch.abs(x) / a)."""
    orig_shape = x.shape
    orig_dtype = x.dtype
    n = x.size
    if n == 0:
        return x

    # `a` is a static Python hyperparameter of the module.
    # TODO(synk): if `a` must be a traced scalar, pass it via
    # PrefetchScalarGridSpec(num_scalar_prefetch=1) instead of float().
    neg_inv_a = -1.0 / float(a)

    itemsize = jnp.dtype(orig_dtype).itemsize
    # Dtype-aware minimum sublane count for full vreg packing.
    min_sublane = {4: 8, 2: 16, 1: 32}.get(itemsize, 8)

    x_flat = jnp.reshape(x, (-1,))
    n_main = (n // _LANE) * _LANE  # 128-aligned prefix handled by the kernel

    out_parts = []

    if n_main > 0:
        # Widest lane-dense last dim (multiple of 128) dividing the prefix.
        width = _LANE
        for w in (4096, 2048, 1024, 512, 256, 128):
            if n_main % w == 0:
                width = w
                break
        rows = n_main // width

        prefix = x_flat if n_main == n else x_flat[:n_main]
        x2d = jnp.reshape(prefix, (rows, width))

        # Byte-based block sizing: ~2 MiB blocks regardless of dtype.
        block_elems = max(_TARGET_BLOCK_BYTES // itemsize, width * min_sublane)
        block_rows = max(
            min_sublane,
            (block_elems // width) // min_sublane * min_sublane,
        )

        if rows >= 2 * min_sublane:
            # Ensure >=2 grid steps so both v7x TensorCores share the stream.
            half_rows = pl.cdiv(pl.cdiv(rows, 2), min_sublane) * min_sublane
            block_rows = min(block_rows, half_rows)
        if block_rows >= rows:
            block_rows = rows  # single block equals full dim -> always legal

        grid = (pl.cdiv(rows, block_rows),)

        kernel = functools.partial(_laplacian_kernel, neg_inv_a=neg_inv_a)

        out2d = pl.pallas_call(
            kernel,
            out_shape=jax.ShapeDtypeStruct((rows, width), orig_dtype),
            grid_spec=pltpu.PrefetchScalarGridSpec(
                num_scalar_prefetch=0,
                grid=grid,
                in_specs=[pl.BlockSpec((block_rows, width), lambda i: (i, 0))],
                out_specs=pl.BlockSpec((block_rows, width), lambda i: (i, 0)),
            ),
            compiler_params=pltpu.CompilerParams(
                dimension_semantics=("parallel",),
            ),
            cost_estimate=pl.CostEstimate(
                flops=2 * n_main,
                transcendentals=n_main,
                bytes_accessed=2 * n_main * itemsize,
            ),
        )(x2d)

        if n_main == n:
            # Common case (NCHW etc.): no pad, no slice, no concat.
            return jnp.reshape(out2d, orig_shape)
        out_parts.append(jnp.reshape(out2d, (-1,)))

    # Rare ragged path: <128-element tail handled with plain jnp (no full-array
    # pad copy; only the tiny tail is computed outside the kernel).
    tail = x_flat[n_main:]
    tail_out = jnp.exp(
        jnp.abs(tail.astype(jnp.float32)) * neg_inv_a
    ).astype(orig_dtype)
    out_parts.append(tail_out)

    return jnp.reshape(jnp.concatenate(out_parts), orig_shape)


if __name__ == "__main__":
    key = jax.random.PRNGKey(0)

    # NCHW, small shapes: batch=2, channels=4, spatial=16x16 (n % 128 == 0).
    x = jax.random.normal(key, (2, 4, 16, 16), dtype=jnp.float32)
    a = 1.0
    y = jax.block_until_ready(laplacian(x, a))
    ref = jnp.exp(-jnp.abs(x) / a)
    assert y.shape == x.shape and y.dtype == x.dtype
    assert jnp.allclose(y, ref, atol=1e-6, rtol=1e-6)

    # Ragged-size check (n not a multiple of 128) with a != 1.
    key2 = jax.random.PRNGKey(0)
    x2 = jax.random.normal(key2, (5, 131), dtype=jnp.float32)
    a2 = 2.0
    y2 = jax.block_until_ready(laplacian(x2, a2))
    ref2 = jnp.exp(-jnp.abs(x2) / a2)
    assert y2.shape == x2.shape and y2.dtype == x2.dtype
    assert jnp.allclose(y2, ref2, atol=1e-6, rtol=1e-6)

    print("KERNEL_OK")
</pallas_src>

<mosaic_0001>
module attributes {stable_mosaic.version = 11 : i64} {
  func.func @_laplacian_kernel(%arg0: i32, %arg1: memref<1x2048xf32, #tpu.memory_space<vmem>>, %arg2: memref<1x2048xf32, #tpu.memory_space<vmem>>) attributes {dimension_semantics = [#tpu.dimension_semantics<parallel>], iteration_bounds = array<i64: 1>, scalar_prefetch = 0 : i64, scratch_operands = 0 : i64, tpu.core_type = #tpu.core_type<tc>, window_params = [{transform_indices = @transform_0, window_bounds = array<i64: 1, 2048>}, {transform_indices = @transform_1, window_bounds = array<i64: 1, 2048>}]} {
    %c0 = arith.constant 0 : index
    %c0_0 = arith.constant 0 : index
    %0 = vector.load %arg1[%c0, %c0_0] : memref<1x2048xf32, #tpu.memory_space<vmem>>, vector<1x2048xf32>
    %1 = math.absf %0 : vector<1x2048xf32>
    %cst = arith.constant -1.000000e+00 : f32
    %2 = vector.broadcast %cst : f32 to vector<1x2048xf32>
    %3 = arith.mulf %1, %2 : vector<1x2048xf32>
    %4 = math.exp %3 : vector<1x2048xf32>
    %c0_1 = arith.constant 0 : index
    %c0_2 = arith.constant 0 : index
    %5 = vector.load %arg2[%c0_1, %c0_2] : memref<1x2048xf32, #tpu.memory_space<vmem>>, vector<1x2048xf32>
    tpu.vector_store %arg2[%c0_1, %c0_2], %4 {strides = array<i32>} : memref<1x2048xf32, #tpu.memory_space<vmem>>, vector<1x2048xf32>,
    return
  }
  func.func @transform_0(%arg0: i32) -> (i32, i32) {
    %c0_i32 = arith.constant 0 : i32
    %c0_i32_0 = arith.constant 0 : i32
    return %arg0, %c0_i32 : i32, i32
  }
  func.func @transform_1(%arg0: i32) -> (i32, i32) {
    %c0_i32 = arith.constant 0 : i32
    %c0_i32_0 = arith.constant 0 : i32
    return %arg0, %c0_i32 : i32, i32
  }
}

</mosaic_0001>

<bundles_post_ra>
// kernel: tpu_custom_call.1
= control target key start
LH: loop header
LB: loop body
LE: loop exit
PB: predicated region body
PF: predicated region fallthrough
CT: control target
= control target key end

     0   :  { %6 = vsyncpa [#allocation3], 0  ;;  %s138_s0 = inlined_call_operand.hbm [shape: f32[1,2048], index: 0, kind: input, shape index: {}]   ;;  %s139_s1 = inlined_call_operand.hbm [shape: f32[1,2048], index: 1, kind: output, shape index: {}]  }
   0x1   :  { %7 = vsyncpa [#allocation4], 0  ;;  %s102_s6 = smov [#allocation2]   ;;  %s54_s10 = scalar_lea.hbm %s138_s0, 256 }
   0x2   :  { %s14_s7 = sshll.u32 %s102_s6, 4  ;;  %p55_p0 = scmp.ne.s32.totalorder %s138_s0, %s54_s10  ;;  %s15_s7 = int_to_ptr.vmem [resolvable:$true] %s14_s7 }
   0x3   :  { %p58_p1 = scmp.lt.u32.totalorder %s54_s10, %s138_s0 }
   0x5   :  { %p60_p2 = pnand %p58_p1, %p55_p0 }
   0x7   :  { %63 = shalt.err (!%p60_p2)
}
   0x8   :  { %s64_s15 = scalar_lea.vmem %s15_s7, 256  ;;  %p69_p4 = scmp.lt.s32.totalorder %s15_s7, %s15_s7 }
   0x9   :  { %p65_p3 = scmp.ne.s32.totalorder %s15_s7, %s64_s15  ;;  %p70_p5 = scmp.lt.s32.totalorder %s64_s15, %s64_s15 }
   0xb   :  { %p71_p6 = por %p70_p5, %p69_p4 }
   0xd   :  { %p72_p7 = pnand %p71_p6, %p65_p3 }
   0xf   :  { %75 = shalt.err (!%p72_p7)
}
  0x10   :  { %17 = dma.hbm_to_vmem [thread:$0]  %s138_s0, 256, %s15_s7, [#allocation3]  }
  0x11   :  { %98 = dma.done.wait [#allocation3], 256  }
  0x12   :  { %99 = vsyncadd [#allocation3], 4294967040  ;;  %v21_v0 = vld [vmem:[#allocation2] sm:$0xff]  ;;  %v22_v1 = vld [vmem:[#allocation2 + $0x8] sm:$0xff]  ;;  %s103_s18 = smov [#allocation5]  }
  0x13   :  { %v23_v2 = vand.u32 2147483647, %v21_v0  ;;  %v24_v3 = vand.u32 2147483647, %v22_v1  ;;  %s39_s19 = sshll.u32 %s103_s18, 4  ;;  %s40_s19 = int_to_ptr.vmem [resolvable:$true] %s39_s19 }
  0x14   :  { %s76_s0 = scalar_lea.vmem %s40_s19, 256  ;;  %p81_p9 = scmp.lt.s32.totalorder %s40_s19, %s40_s19 }
  0x15   :  { %v25_v4 = vmul.f32 -1.0, %v23_v2  ;;  %v26_v5 = vmul.f32 -1.0, %v24_v3  ;;  %p77_p8 = scmp.ne.s32.totalorder %s40_s19, %s76_s0  ;;  %p82_p10 = scmp.lt.s32.totalorder %s76_s0, %s76_s0 }
  0x17   :  { %v27_v6 = vmul.f32 1.442695, %v25_v4  ;;  %v29_v7 = vmul.f32 1.442695, %v26_v5  ;;  %p83_p11 = por %p82_p10, %p81_p9 }
  0x19   :  { %50 = vpow2.f32 %v27_v6  ;;  %p84_p12 = pnand %p83_p11, %p77_p8 }
  0x1a   :  { %52 = vpow2.f32 %v29_v7 }
  0x23   :  { %v51_v8 = vpop.eup %50 }
  0x24   :  { %v53_v9 = vpop.eup %52  ;;  %31 = vst [vmem:[#allocation5] sm:$0xff] %v51_v8 }
  0x25   :  { %32 = vst [vmem:[#allocation5 + $0x8] sm:$0xff] %v53_v9 }
  0x26   :  { %87 = shalt.err (!%p84_p12)
}
  0x27   :  { %s88_s22 = scalar_lea.hbm %s139_s1, 256 }
  0x28   :  { %p89_p13 = scmp.ne.s32.totalorder %s139_s1, %s88_s22  ;;  %p92_p0 = scmp.lt.u32.totalorder %s88_s22, %s139_s1 }
  0x2a   :  { %p94_p1 = pnand %p92_p0, %p89_p13 }
  0x2c   :  { %97 = shalt.err (!%p94_p1)
}
  0x2d   :  { %42 = dma.vmem_to_hbm [thread:$0]  %s40_s19, 256, %s139_s1, [#allocation4]  }
  0x2e   :  { %100 = dma.done.wait [#allocation4], 256  }
  0x2f   :  { %101 = vsyncadd [#allocation4], 4294967040 }
  0x30   :  { %46 = vsyncpa [#allocation3], 1 }
  0x31   :  { %47 = vsyncpa [#allocation4], 1 }

</bundles_post_ra>
